<compile_context>
chip_gen: v7x
topology: tpu7x:2x2x1
jax: 0.10.0
libtpu: 0.0.40
codegen_flags: <defaults>
</compile_context>

<pallas_src>
import jax
import jax.numpy as jnp
from jax.experimental import pallas as pl
from jax.experimental.pallas import tpu as pltpu


# ----------------------------------------------------------------------------
# Fused AttentionGate kernel, one block of TM packed rows per grid step.
#   g_ref:    (TM, P*F_g)       x_ref:  (TM, P*F_l)
#   wg_ref:   (P*F_g, P*F_int)  block-diagonal, BN folded in
#   wx_ref:   (P*F_l, P*F_int)  block-diagonal, BN folded in
#   b_ref:    (1, P*F_int)      tiled (bg + bx)
#   spsi_ref: (P*F_int, P*F_l)  psi reduction + per-pixel lane broadcast
#   bpsi_ref: (1, P*F_l)        broadcast psi bias
#   o_ref:    (TM, P*F_l)
# ----------------------------------------------------------------------------
def _attention_gate_kernel(g_ref, x_ref, wg_ref, wx_ref, b_ref,
                           spsi_ref, bpsi_ref, o_ref):
    # 1x1 convs (+ folded BN) over P packed pixels per row (MXU, f32 acc).
    acc = jnp.dot(g_ref[...], wg_ref[...], preferred_element_type=jnp.float32)
    acc = acc + jnp.dot(x_ref[...], wx_ref[...],
                        preferred_element_type=jnp.float32)
    r = jnp.maximum(acc + b_ref[...], 0.0)                     # (TM, P*F_int)

    # psi conv (F_int -> 1) and broadcast of psi across each pixel's F_l
    # lanes fused into one selector matmul -> lane-dense (TM, P*F_l) block.
    logit = jnp.dot(r, spsi_ref[...],
                    preferred_element_type=jnp.float32) + bpsi_ref[...]
    psi = jax.nn.sigmoid(logit)                                # EUP

    o_ref[...] = (x_ref[...].astype(jnp.float32) * psi).astype(o_ref.dtype)


def _pick_pack(F_g, F_l):
    """Pixels packed per row so the streamed arrays are 128-lane dense."""
    c = max(F_g, F_l)
    if c >= 128 or 128 % c != 0:
        return 1
    return 128 // c


def _pick_tile(mp, row_bytes):
    """Packed-row tile: big for bandwidth (~8K pixels), capped by a ~12 MiB
    double-buffered VMEM budget (fits v5e's 16 MiB scoped default), and kept
    to >= 2 grid steps on small inputs for pipelining / v7x megacore."""
    if mp <= 16:
        return mp                                   # single block, full dim
    budget = 12 * 1024 * 1024
    cap = max(8, budget // (6 * row_bytes))         # 3 streamed arrays x 2 buf
    tm = min(2048, cap, mp // 2)
    return max(8, (tm // 8) * 8)


def attention_gate(g, x, params):
    """g: (N,H,W,F_g) NHWC; x: (N,H,W,F_l) NHWC; params: folded weights."""
    N, H, W, Fg = g.shape
    Fl = x.shape[-1]
    Fint = params["wg"].shape[-1]
    out_dtype = x.dtype
    compute_dtype = jnp.bfloat16 if x.dtype == jnp.bfloat16 else jnp.float32

    M = N * H * W
    P = _pick_pack(Fg, Fl)
    Mp = pl.cdiv(M, P)
    Mpad = Mp * P

    g_flat = g.reshape(M, Fg).astype(compute_dtype)
    x_flat = x.reshape(M, Fl).astype(compute_dtype)
    if Mpad != M:
        g_flat = jnp.pad(g_flat, ((0, Mpad - M), (0, 0)))
        x_flat = jnp.pad(x_flat, ((0, Mpad - M), (0, 0)))
    g_packed = g_flat.reshape(Mp, P * Fg)          # free row-major reinterpret
    x_packed = x_flat.reshape(Mp, P * Fl)

    # --- trace-time weight folding into the packed layout -------------------
    eye_p = jnp.eye(P, dtype=jnp.float32)
    wg_bd = jnp.kron(eye_p, params["wg"].astype(jnp.float32))   # (P*Fg, P*Fint)
    wx_bd = jnp.kron(eye_p, params["wx"].astype(jnp.float32))   # (P*Fl, P*Fint)
    b_comb = jnp.tile((params["bg"] + params["bx"]).astype(jnp.float32),
                      P).reshape(1, P * Fint)
    wpsi = params["wpsi"].reshape(Fint, 1).astype(jnp.float32)
    # block p: (F_int, F_l) = wpsi column broadcast -> reduce over F_int and
    # replicate the scalar logit across that pixel's F_l output lanes.
    spsi = jnp.kron(eye_p, wpsi * jnp.ones((1, Fl), jnp.float32))  # (P*Fint, P*Fl)
    bpsi_b = jnp.tile(params["bpsi"].astype(jnp.float32),
                      P * Fl).reshape(1, P * Fl)

    wg_bd = wg_bd.astype(compute_dtype)
    wx_bd = wx_bd.astype(compute_dtype)

    row_bytes = max(P * Fg, P * Fl) * jnp.dtype(compute_dtype).itemsize
    tm = _pick_tile(Mp, row_bytes)
    grid = (pl.cdiv(Mp, tm),)

    out_packed = pl.pallas_call(
        _attention_gate_kernel,
        out_shape=jax.ShapeDtypeStruct((Mp, P * Fl), out_dtype),
        grid=grid,
        in_specs=[
            pl.BlockSpec((tm, P * Fg), lambda i: (i, 0)),        # g pixels
            pl.BlockSpec((tm, P * Fl), lambda i: (i, 0)),        # x pixels
            pl.BlockSpec((P * Fg, P * Fint), lambda i: (0, 0)),  # W_g block-diag
            pl.BlockSpec((P * Fl, P * Fint), lambda i: (0, 0)),  # W_x block-diag
            pl.BlockSpec((1, P * Fint), lambda i: (0, 0)),       # bg + bx
            pl.BlockSpec((P * Fint, P * Fl), lambda i: (0, 0)),  # psi selector
            pl.BlockSpec((1, P * Fl), lambda i: (0, 0)),         # b_psi
        ],
        out_specs=pl.BlockSpec((tm, P * Fl), lambda i: (i, 0)),
        compiler_params=pltpu.CompilerParams(
            dimension_semantics=("parallel",),
        ),
    )(g_packed, x_packed, wg_bd, wx_bd, b_comb, spsi, bpsi_b)

    out = out_packed.reshape(Mpad, Fl)[:M]
    return out.reshape(N, H, W, Fl)


# ----------------------------------------------------------------------------
# Parameter construction (deterministic) with eval-mode BatchNorm folding:
#   BN(conv(x)) = (x@W + b - mean) * gamma/sqrt(var+eps) + beta
#               = x @ (W*s) + ((b - mean)*s + beta),   s = gamma/sqrt(var+eps)
# ----------------------------------------------------------------------------
def make_attention_gate_params(key, F_g, F_l, F_int, eps=1e-5):
    ks = jax.random.split(key, 8)
    wg_conv = 0.1 * jax.random.normal(ks[0], (F_g, F_int), jnp.float32)
    bg_conv = 0.1 * jax.random.normal(ks[1], (F_int,), jnp.float32)
    wx_conv = 0.1 * jax.random.normal(ks[2], (F_l, F_int), jnp.float32)
    bx_conv = 0.1 * jax.random.normal(ks[3], (F_int,), jnp.float32)
    wpsi_conv = 0.1 * jax.random.normal(ks[4], (F_int,), jnp.float32)
    bpsi_conv = 0.1 * jax.random.normal(ks[5], (1,), jnp.float32)

    # BatchNorm affine params; fresh running stats (mean=0, var=1).
    gamma_g = 1.0 + 0.05 * jax.random.normal(ks[6], (F_int,), jnp.float32)
    beta_g = 0.05 * jax.random.normal(ks[7], (F_int,), jnp.float32)
    gamma_x = jnp.ones((F_int,), jnp.float32)
    beta_x = jnp.zeros((F_int,), jnp.float32)
    gamma_p = jnp.ones((1,), jnp.float32)
    beta_p = jnp.zeros((1,), jnp.float32)

    mean, var = 0.0, 1.0
    inv = 1.0 / jnp.sqrt(var + eps)
    sg, sx, sp = gamma_g * inv, gamma_x * inv, gamma_p * inv

    return dict(
        wg=wg_conv * sg[None, :], bg=(bg_conv - mean) * sg + beta_g,
        wx=wx_conv * sx[None, :], bx=(bx_conv - mean) * sx + beta_x,
        wpsi=wpsi_conv * sp, bpsi=(bpsi_conv - mean) * sp + beta_p,
    )


def _reference(g, x, p):
    """Pure-JAX reference of the same (BN-folded) math, in f32."""
    g32 = g.astype(jnp.float32)
    x32 = x.astype(jnp.float32)
    g1 = jnp.einsum("nhwc,cf->nhwf", g32, p["wg"]) + p["bg"]
    x1 = jnp.einsum("nhwc,cf->nhwf", x32, p["wx"]) + p["bx"]
    r = jnp.maximum(g1 + x1, 0.0)
    logit = jnp.sum(r * p["wpsi"], axis=-1, keepdims=True) + p["bpsi"]
    psi = jax.nn.sigmoid(logit)
    return x32 * psi


if __name__ == "__main__":
    # AttentionGate(F_g=32, F_l=32, F_int=16) on NHWC inputs.
    F_g, F_l, F_int = 32, 32, 16
    key = jax.random.PRNGKey(0)
    kg, kx, kp = jax.random.split(key, 3)
    params = make_attention_gate_params(kp, F_g, F_l, F_int)

    # --- main f32 test: divisible spatial dims -------------------------------
    N, H, W = 2, 16, 16
    g = jax.random.normal(kg, (N, H, W, F_g), jnp.float32)
    x = jax.random.normal(kx, (N, H, W, F_l), jnp.float32)
    out = jax.block_until_ready(attention_gate(g, x, params))
    assert out.shape == (N, H, W, F_l), out.shape
    assert jnp.all(jnp.isfinite(out))
    ref = _reference(g, x, params)
    max_err = float(jnp.max(jnp.abs(out - ref)))
    assert max_err < 1e-4, max_err

    # --- ragged test: M not divisible by the pack factor or the tile ---------
    N2, H2, W2 = 2, 15, 15
    g2 = jax.random.normal(kg, (N2, H2, W2, F_g), jnp.float32)
    x2 = jax.random.normal(kx, (N2, H2, W2, F_l), jnp.float32)
    out2 = jax.block_until_ready(attention_gate(g2, x2, params))
    assert out2.shape == (N2, H2, W2, F_l), out2.shape
    ref2 = _reference(g2, x2, params)
    max_err2 = float(jnp.max(jnp.abs(out2 - ref2)))
    assert max_err2 < 1e-4, max_err2

    # --- bf16 I/O test (halved HBM traffic path) -----------------------------
    g_bf = g.astype(jnp.bfloat16)
    x_bf = x.astype(jnp.bfloat16)
    out_bf = jax.block_until_ready(attention_gate(g_bf, x_bf, params))
    assert out_bf.dtype == jnp.bfloat16
    assert jnp.all(jnp.isfinite(out_bf.astype(jnp.float32)))
    ref_bf = _reference(g_bf, x_bf, params)
    max_err_bf = float(jnp.max(jnp.abs(out_bf.astype(jnp.float32) - ref_bf)))
    assert max_err_bf < 0.15, max_err_bf

    print("KERNEL_OK")
</pallas_src>

<mosaic_0001>
module attributes {stable_mosaic.version = 11 : i64} {
  func.func @_attention_gate_kernel(%arg0: i32, %arg1: memref<64x128xf32, #tpu.memory_space<vmem>>, %arg2: memref<64x128xf32, #tpu.memory_space<vmem>>, %arg3: memref<128x64xf32, #tpu.memory_space<vmem>>, %arg4: memref<128x64xf32, #tpu.memory_space<vmem>>, %arg5: memref<1x64xf32, #tpu.memory_space<vmem>>, %arg6: memref<64x128xf32, #tpu.memory_space<vmem>>, %arg7: memref<1x128xf32, #tpu.memory_space<vmem>>, %arg8: memref<64x128xf32, #tpu.memory_space<vmem>>) attributes {dimension_semantics = [#tpu.dimension_semantics<parallel>], iteration_bounds = array<i64: 2>, scalar_prefetch = 0 : i64, scratch_operands = 0 : i64, tpu.core_type = #tpu.core_type<tc>, window_params = [{transform_indices = @transform_0, window_bounds = array<i64: 64, 128>}, {transform_indices = @transform_1, window_bounds = array<i64: 64, 128>}, {pipeline_mode = #tpu.pipeline_mode<synchronous>, transform_indices = @transform_2, window_bounds = array<i64: 128, 64>}, {pipeline_mode = #tpu.pipeline_mode<synchronous>, transform_indices = @transform_3, window_bounds = array<i64: 128, 64>}, {pipeline_mode = #tpu.pipeline_mode<synchronous>, transform_indices = @transform_4, window_bounds = array<i64: 1, 64>}, {pipeline_mode = #tpu.pipeline_mode<synchronous>, transform_indices = @transform_5, window_bounds = array<i64: 64, 128>}, {pipeline_mode = #tpu.pipeline_mode<synchronous>, transform_indices = @transform_6, window_bounds = array<i64: 1, 128>}, {transform_indices = @transform_7, window_bounds = array<i64: 64, 128>}]} {
    %c0 = arith.constant 0 : index
    %c0_0 = arith.constant 0 : index
    %0 = vector.load %arg1[%c0, %c0_0] : memref<64x128xf32, #tpu.memory_space<vmem>>, vector<64x128xf32>
    %c0_1 = arith.constant 0 : index
    %c0_2 = arith.constant 0 : index
    %1 = vector.load %arg3[%c0_1, %c0_2] : memref<128x64xf32, #tpu.memory_space<vmem>>, vector<128x64xf32>
    %cst = arith.constant dense<0.000000e+00> : vector<64x64xf32>
    %2 = tpu.matmul %0, %1, %cst {dimension_numbers = #tpu.dot_dimension_numbers<[1], [0], [0], [1], [0, 0, 1, 1], [], []>} : vector<64x128xf32>, vector<128x64xf32>, vector<64x64xf32> -> vector<64x64xf32>
    %c0_3 = arith.constant 0 : index
    %c0_4 = arith.constant 0 : index
    %3 = vector.load %arg2[%c0_3, %c0_4] : memref<64x128xf32, #tpu.memory_space<vmem>>, vector<64x128xf32>
    %c0_5 = arith.constant 0 : index
    %c0_6 = arith.constant 0 : index
    %4 = vector.load %arg4[%c0_5, %c0_6] : memref<128x64xf32, #tpu.memory_space<vmem>>, vector<128x64xf32>
    %cst_7 = arith.constant dense<0.000000e+00> : vector<64x64xf32>
    %5 = tpu.matmul %3, %4, %cst_7 {dimension_numbers = #tpu.dot_dimension_numbers<[1], [0], [0], [1], [0, 0, 1, 1], [], []>} : vector<64x128xf32>, vector<128x64xf32>, vector<64x64xf32> -> vector<64x64xf32>
    %6 = arith.addf %2, %5 : vector<64x64xf32>
    %c0_8 = arith.constant 0 : index
    %c0_9 = arith.constant 0 : index
    %7 = vector.load %arg5[%c0_8, %c0_9] : memref<1x64xf32, #tpu.memory_space<vmem>>, vector<1x64xf32>
    %8 = vector.broadcast %7 : vector<1x64xf32> to vector<64x64xf32>
    %9 = arith.addf %6, %8 : vector<64x64xf32>
    %cst_10 = arith.constant 0.000000e+00 : f32
    %10 = vector.broadcast %cst_10 : f32 to vector<64x64xf32>
    %11 = arith.maximumf %9, %10 : vector<64x64xf32>
    %c0_11 = arith.constant 0 : index
    %c0_12 = arith.constant 0 : index
    %12 = vector.load %arg6[%c0_11, %c0_12] : memref<64x128xf32, #tpu.memory_space<vmem>>, vector<64x128xf32>
    %cst_13 = arith.constant dense<0.000000e+00> : vector<64x128xf32>
    %13 = tpu.matmul %11, %12, %cst_13 {dimension_numbers = #tpu.dot_dimension_numbers<[1], [0], [0], [1], [0, 0, 1, 1], [], []>} : vector<64x64xf32>, vector<64x128xf32>, vector<64x128xf32> -> vector<64x128xf32>
    %c0_14 = arith.constant 0 : index
    %c0_15 = arith.constant 0 : index
    %14 = vector.load %arg7[%c0_14, %c0_15] : memref<1x128xf32, #tpu.memory_space<vmem>>, vector<1x128xf32>
    %15 = vector.broadcast %14 : vector<1x128xf32> to vector<64x128xf32>
    %16 = arith.addf %13, %15 : vector<64x128xf32>
    %17 = arith.negf %16 : vector<64x128xf32>
    %18 = math.exp %17 : vector<64x128xf32>
    %cst_16 = arith.constant 1.000000e+00 : f32
    %19 = vector.broadcast %cst_16 : f32 to vector<64x128xf32>
    %20 = arith.addf %19, %18 : vector<64x128xf32>
    %21 = arith.divf %19, %20 : vector<64x128xf32>
    %c0_17 = arith.constant 0 : index
    %c0_18 = arith.constant 0 : index
    %22 = vector.load %arg2[%c0_17, %c0_18] : memref<64x128xf32, #tpu.memory_space<vmem>>, vector<64x128xf32>
    %23 = arith.mulf %22, %21 : vector<64x128xf32>
    %c0_19 = arith.constant 0 : index
    %c0_20 = arith.constant 0 : index
    %24 = vector.load %arg8[%c0_19, %c0_20] : memref<64x128xf32, #tpu.memory_space<vmem>>, vector<64x128xf32>
    tpu.vector_store %arg8[%c0_19, %c0_20], %23 {strides = array<i32>} : memref<64x128xf32, #tpu.memory_space<vmem>>, vector<64x128xf32>,
    return
  }
  func.func @transform_0(%arg0: i32) -> (i32, i32) {
    %c0_i32 = arith.constant 0 : i32
    %c0_i32_0 = arith.constant 0 : i32
    return %arg0, %c0_i32 : i32, i32
  }
  func.func @transform_1(%arg0: i32) -> (i32, i32) {
    %c0_i32 = arith.constant 0 : i32
    %c0_i32_0 = arith.constant 0 : i32
    return %arg0, %c0_i32 : i32, i32
  }
  func.func @transform_2(%arg0: i32) -> (i32, i32) {
    %c0_i32 = arith.constant 0 : i32
    %c0_i32_0 = arith.constant 0 : i32
    %c0_i32_1 = arith.constant 0 : i32
    return %c0_i32, %c0_i32_0 : i32, i32
  }
  func.func @transform_3(%arg0: i32) -> (i32, i32) {
    %c0_i32 = arith.constant 0 : i32
    %c0_i32_0 = arith.constant 0 : i32
    %c0_i32_1 = arith.constant 0 : i32
    return %c0_i32, %c0_i32_0 : i32, i32
  }
  func.func @transform_4(%arg0: i32) -> (i32, i32) {
    %c0_i32 = arith.constant 0 : i32
    %c0_i32_0 = arith.constant 0 : i32
    %c0_i32_1 = arith.constant 0 : i32
    return %c0_i32, %c0_i32_0 : i32, i32
  }
  func.func @transform_5(%arg0: i32) -> (i32, i32) {
    %c0_i32 = arith.constant 0 : i32
    %c0_i32_0 = arith.constant 0 : i32
    %c0_i32_1 = arith.constant 0 : i32
    return %c0_i32, %c0_i32_0 : i32, i32
  }
  func.func @transform_6(%arg0: i32) -> (i32, i32) {
    %c0_i32 = arith.constant 0 : i32
    %c0_i32_0 = arith.constant 0 : i32
    %c0_i32_1 = arith.constant 0 : i32
    return %c0_i32, %c0_i32_0 : i32, i32
  }
  func.func @transform_7(%arg0: i32) -> (i32, i32) {
    %c0_i32 = arith.constant 0 : i32
    %c0_i32_0 = arith.constant 0 : i32
    return %arg0, %c0_i32 : i32, i32
  }
}

</mosaic_0001>

<bundles_post_ra>
// kernel: tpu_custom_call.1
= control target key start
LH: loop header
LB: loop body
LE: loop exit
PB: predicated region body
PF: predicated region fallthrough
CT: control target
= control target key end

     0   :  { %12 = vsyncpa [#allocation3], 0  ;;  %s1664_s0 = inlined_call_operand.vmem [shape: f32[128,128], index: 0, kind: input, shape index: {}]   ;;  %s1665_s1 = inlined_call_operand.vmem [shape: f32[128,128], index: 1, kind: input, shape index: {}]   ;;  %s1666_s2 = inlined_call_operand.vmem [shape: f32[128,64], index: 2, kind: input, shape index: {}]   ;;  %s1667_s3 = inlined_call_operand.vmem [shape: f32[128,64], index: 3, kind: input, shape index: {}]   ;;  %s1668_s4 = inlined_call_operand.vmem [shape: f32[1,64], index: 4, kind: input, shape index: {}]   ;;  %s1669_s5 = inlined_call_operand.vmem [shape: f32[64,128], index: 5, kind: input, shape index: {}]   ;;  %s1670_s6 = inlined_call_operand.vmem [shape: f32[1,128], index: 6, kind: input, shape index: {}]   ;;  %s1671_s7 = inlined_call_operand.hbm [shape: f32[128,128], index: 7, kind: output, shape index: {}]  }
   0x1   :  { %14 = vsyncpa [#allocation3 + $0x1], 0  ;;  %s1369_s24 = smov 0   ;;  %s1371_s25 = smov 0  }
   0x2   :  { %s1373_s26 = smov 0   ;;  %s1375_s27 = smov 0  }
   0x3 LB: > { %s1390_s28 = sadd.s32 4294967295, %s1324_s27   ;;  %s880_s29 = sadd.s32 4294967294, %s1324_s27   ;;  %s1324_s27 = sphi %s1375_s27, %s1677_s27   ;;  %s1320_s26 = sphi %s1373_s26, %s1676_s26   ;;  %s1316_s25 = sphi %s1371_s25, %s1675_s25   ;;  %s1312_s24 = sphi %s1369_s24, %s1674_s24  }
   0x4   : > { %s1394_s30 = sadd.s32 1, %s1324_s27   ;;  %s184_s8 = sadd.s32 1, %s1320_s26 }
   0x5   : > { %s181_s9 = ssub.s32 %s1324_s27, %s1394_s30  ;;  %p194_p0 = scmp.ne.s32.totalorder %s1320_s26, %s1316_s25 }
   0x6   : > { %p182_p1 = scmp.eq.s32.totalorder %s181_s9, 0  ;;  %p195_p2 = scmp.eq.s32.totalorder %s1390_s28, 1 }
   0x7   : > { %p200_p3 = scmp.ne.s32.totalorder %s1316_s25, %s1312_s24  ;;  %p201_p4 = scmp.eq.s32.totalorder %s880_s29, 1 }
   0x8   : > { %s1405_s10 = scalar_select %p182_p1, %s1320_s26, %s184_s8  }
   0x9   : > { %p1407_p5 = por %p195_p2, %p194_p0  ;;  %p1411_p6 = por %p201_p4, %p200_p3 }
   0xa   : > { %p883_p7 = scmp.ge.s32.totalorder %s1324_s27, 1  ;;  %p252_p8 = scmp.lt.s32.totalorder %s1324_s27, 3 }
   0xc   : > { %p253_p9 = pnand %p883_p7, %p252_p8 }
   0xd   : > { %v334_v0 = vld [vmem:[%s1667_s3] sm:$0xff] (!%p253_p9)  ;;  %v335_v1 = vld [vmem:[%s1667_s3 + $0x8] sm:$0xff] (!%p253_p9)  ;;  %s885_s19 = sshll.u32 (!%p253_p9), %s1390_s28, 3  ;;  %v336_v5 = vld [vmem:[%s1667_s3 + $0x10] sm:$0xff] (!%p253_p9)  ;;  %vm598_vm0 = vcmask (!%p253_p9), 523264   ;;  %s286_s15 = sand.u32 (!%p253_p9), 1, %s1316_s25  }
   0xe   : > { %256 = sbr.rel (%p253_p9) target bundleno = 541 (0x21d), region = 48  ;;  %v310_v2 = vld [vmem:[%s1666_s2] sm:$0xff] (!%p253_p9)  ;;  %v1093_v3 = vpack.c.bf16 (!%p253_p9), %v335_v1, %v334_v0  ;;  %v311_v4 = vld [vmem:[%s1666_s2 + $0x8] sm:$0xff] (!%p253_p9)  ;;  %v337_v6 = vld [vmem:[%s1667_s3 + $0x18] sm:$0xff] (!%p253_p9)  ;;  %p290_p10 = scmp.lt.s32.totalorder (!%p253_p9), %s885_s19, 15 }
   0xf   : > { %v1125_v7 = vpack.c.bf16 (!%p253_p9), %v311_v4, %v310_v2  ;;  %v1097_v8 = vpack.c.bf16 (!%p253_p9), %v337_v6, %v336_v5  ;;  %v312_v9 = vld [vmem:[%s1666_s2 + $0x10] sm:$0xff] (!%p253_p9)  ;;  %v313_v10 = vld [vmem:[%s1666_s2 + $0x18] sm:$0xff] (!%p253_p9)  ;;  %v338_v11 = vld [vmem:[%s1667_s3 + $0x20] sm:$0xff] (!%p253_p9)  ;;  %s884_s16 = sshll.u32 (!%p253_p9), %s286_s15, 6  ;;  %s912_s18 = sshll.u32 (!%p253_p9), %s1390_s28, 10 }
  0x10   : > { %1094 = vmatprep.subr.bf16.mxu1 (!%p253_p9), %v1093_v3  ;;  %v1129_v12 = vpack.c.bf16 (!%p253_p9), %v313_v10, %v312_v9  ;;  %v339_v13 = vld [vmem:[%s1667_s3 + $0x28] sm:$0xff] (!%p253_p9)  ;;  %v314_v14 = vld [vmem:[%s1666_s2 + $0x20] sm:$0xff] (!%p253_p9)  ;;  %v340_v18 = vld [vmem:[%s1667_s3 + $0x30] sm:$0xff] (!%p253_p9)  ;;  %s288_s17 = scalar_lea.vmem (!%p253_p9), [#allocation2], %s884_s16  ;;  %s1623_s28 = scalar_lea.sflag (!%p253_p9), [#allocation3], %s286_s15 }
  0x11   : > { %v315_v15 = vld [vmem:[%s1666_s2 + $0x28] sm:$0xff] (!%p253_p9)  ;;  %1126 = vmatprep.subr.bf16.mxu0 (!%p253_p9), %v1125_v7  ;;  %1096 = vmatpush3.bf16.msra.mxu1 (!%p253_p9), %v1093_v3  ;;  %v1101_v16 = vpack.c.bf16 (!%p253_p9), %v339_v13, %v338_v11  ;;  %v341_v19 = vld [vmem:[%s1667_s3 + $0x38] sm:$0xff] (!%p253_p9)  ;;  %v316_v20 = vld [vmem:[%s1666_s2 + $0x30] sm:$0xff] (!%p253_p9) }
  0x12   : > { %1128 = vmatpush3.bf16.msra.mxu0 (!%p253_p9), %v1125_v7  ;;  %1098 = vmatprep.subr.bf16.mxu1 (!%p253_p9), %v1097_v8  ;;  %v1133_v17 = vpack.c.bf16 (!%p253_p9), %v315_v15, %v314_v14  ;;  %v317_v21 = vld [vmem:[%s1666_s2 + $0x38] sm:$0xff] (!%p253_p9)  ;;  %v1105_v22 = vpack.c.bf16 (!%p253_p9), %v341_v19, %v340_v18  ;;  %v342_v24 = vld [vmem:[%s1667_s3 + $0x40] sm:$0xff] (!%p253_p9)  ;;  %v343_v25 = vld [vmem:[%s1667_s3 + $0x48] sm:$0xff] (!%p253_p9) }
  0x13   : > { %1130 = vmatprep.subr.bf16.mxu0 (!%p253_p9), %v1129_v12  ;;  %v1137_v23 = vpack.c.bf16 (!%p253_p9), %v317_v21, %v316_v20  ;;  %v318_v27 = vld [vmem:[%s1666_s2 + $0x40] sm:$0xff] (!%p253_p9)  ;;  %v319_v28 = vld [vmem:[%s1666_s2 + $0x48] sm:$0xff] (!%p253_p9)  ;;  %v1109_v30 = vpack.c.bf16 (!%p253_p9), %v343_v25, %v342_v24  ;;  %v344_v32 = vld [vmem:[%s1667_s3 + $0x50] sm:$0xff] (!%p253_p9) }
  0x14   : > { %v1141_v31 = vpack.c.bf16 (!%p253_p9), %v319_v28, %v318_v27  ;;  %v345_v33 = vld [vmem:[%s1667_s3 + $0x58] sm:$0xff] (!%p253_p9)  ;;  %v320_v34 = vld [vmem:[%s1666_s2 + $0x50] sm:$0xff] (!%p253_p9)  ;;  %v346_v38 = vld [vmem:[%s1667_s3 + $0x60] sm:$0xff] (!%p253_p9) }
  0x15   : > { %s1679_s19 = smov (!%p290_p10, %s885_s19), 15  ;;  %1100 = vmatpush3.bf16.msra.mxu1 %v1097_v8  ;;  %v321_v35 = vld [vmem:[%s1666_s2 + $0x58] sm:$0xff]  ;;  %v1113_v36 = vpack.c.bf16 %v345_v33, %v344_v32  ;;  %v347_v39 = vld [vmem:[%s1667_s3 + $0x68] sm:$0xff]  ;;  %v322_v40 = vld [vmem:[%s1666_s2 + $0x60] sm:$0xff] }
  0x16   : > { %s886_s8 = sshll.u32 %s1679_s19, 3  ;;  %1132 = vmatpush3.bf16.msra.mxu0 %v1129_v12  ;;  %1102 = vmatprep.subr.bf16.mxu1 %v1101_v16  ;;  %v1145_v37 = vpack.c.bf16 %v321_v35, %v320_v34  ;;  %v323_v41 = vld [vmem:[%s1666_s2 + $0x68] sm:$0xff]  ;;  %v1117_v42 = vpack.c.bf16 %v347_v39, %v346_v38  ;;  %v348_v44 = vld [vmem:[%s1667_s3 + $0x70] sm:$0xff]  ;;  %v349_v45 = vld [vmem:[%s1667_s3 + $0x78] sm:$0xff]  ;;  %s1326_s19 = smov [#allocation2]  }
  0x17   : > { %s1469_s22 = scalar_lea.vmem %s1665_s1, %s886_s8  ;;  %s1474_s9 = scalar_lea.vmem %s1664_s0, %s886_s8  ;;  %1134 = vmatprep.subr.bf16.mxu0 %v1133_v17  ;;  %v1149_v43 = vpack.c.bf16 %v323_v41, %v322_v40  ;;  %v324_v46 = vld [vmem:[%s1666_s2 + $0x70] sm:$0xff]  ;;  %v325_v47 = vld [vmem:[%s1666_s2 + $0x78] sm:$0xff]  ;;  %v1121_v48 = vpack.c.bf16 %v349_v45, %v348_v44  ;;  %v583_v50 = vld [vmem:[%s1669_s5] sm:$0xff] }
  0x18   : > { %v1483_v26 = vld [vmem:[%s1469_s22] sm:$0xff]  ;;  %v1153_v49 = vpack.c.bf16 %v325_v47, %v324_v46  ;;  %v584_v51 = vld [vmem:[%s1669_s5 + $0x8] sm:$0xff]  ;;  %v585_v53 = vld [vmem:[%s1669_s5 + $0x10] sm:$0xff]  ;;  %s806_s8 = sshll.u32 %s288_s17, 4  ;;  %s1266_s23 = sshll.u32 %s1326_s19, 4  ;;  %s1618_s8 = int_to_ptr.vmem [resolvable:$true] %s806_s8  ;;  %s1267_s23 = int_to_ptr.vmem [resolvable:$false] %s1266_s23 }
  0x19   : > { %1009 = vmatprep.mubr.f32.mxu1 %v1483_v26  ;;  %v302_v29 = vld [vmem:[%s1474_s9] sm:$0xff]  ;;  %1104 = vmatpush3.bf16.msra.mxu1 %v1101_v16  ;;  %v1157_v52 = vpack.c.bf16 %v584_v51, %v583_v50  ;;  %v586_v54 = vld [vmem:[%s1669_s5 + $0x18] sm:$0xff]  ;;  %v1542_v55 = vld [vmem:[%s1469_s22 + $0x8] sm:$0xff]  ;;  %s1268_s29 = scalar_lea.vmem %s1267_s23, 2048  ;;  %p1269_p0 = scmp.lt.s32.totalorder %s1618_s8, %s1267_s23 }
  0x1a   : > { %1053 = vmatprep.mubr.f32.mxu0 %v302_v29  ;;  %1136 = vmatpush3.bf16.msra.mxu0 %v1133_v17  ;;  %v303_v56 = vld [vmem:[%s1474_s9 + $0x8] sm:$0xff]  ;;  %v1546_v57 = vld [vmem:[%s1469_s22 + $0x10] sm:$0xff]  ;;  %v1161_v59 = vpack.c.bf16 %v586_v54, %v585_v53  ;;  %v1552_v60 = vld [vmem:[%s1469_s22 + $0x18] sm:$0xff] }
  0x1b   : > { %1106 = vmatprep.subr.bf16.mxu1 %v1105_v22  ;;  %1138 = vmatprep.subr.bf16.mxu0 %v1137_v23  ;;  %v304_v58 = vld [vmem:[%s1474_s9 + $0x10] sm:$0xff]  ;;  %v305_v61 = vld [vmem:[%s1474_s9 + $0x18] sm:$0xff]  ;;  %v1556_v62 = vld [vmem:[%s1469_s22 + $0x20] sm:$0xff] }
  0x1c   : > { %v306_v63 = vld [vmem:[%s1474_s9 + $0x20] sm:$0xff]  ;;  %v1562_v0 = vld [vmem:[%s1469_s22 + $0x28] sm:$0xff]  ;;  %v1566_v2 = vld [vmem:[%s1469_s22 + $0x30] sm:$0xff] }
  0x1d   : > { %1108 = vmatpush3.bf16.msra.mxu1 %v1105_v22  ;;  %v307_v1 = vld [vmem:[%s1474_s9 + $0x28] sm:$0xff]  ;;  %v308_v3 = vld [vmem:[%s1474_s9 + $0x30] sm:$0xff]  ;;  %v1572_v4 = vld [vmem:[%s1469_s22 + $0x38] sm:$0xff]  ;;  %s1616_s22 = scalar_lea.hbm %s1671_s7, %s912_s18 }
  0x1e   : > { %1140 = vmatpush3.bf16.msra.mxu0 %v1137_v23  ;;  %1110 = vmatprep.subr.bf16.mxu1 %v1109_v30  ;;  %v309_v5 = vld [vmem:[%s1474_s9 + $0x38] sm:$0xff]  ;;  %v587_v6 = vld [vmem:[%s1669_s5 + $0x20] sm:$0xff]  ;;  %v588_v7 = vld [vmem:[%s1669_s5 + $0x28] sm:$0xff]  ;;  %s1262_s9 = scalar_lea.vmem %s1618_s8, 1024 }
  0x1f   : > { %1142 = vmatprep.subr.bf16.mxu0 %v1141_v31  ;;  %v1165_v8 = vpack.c.bf16 %v588_v7, %v587_v6  ;;  %v589_v9 = vld [vmem:[%s1669_s5 + $0x30] sm:$0xff]  ;;  %v590_v10 = vld [vmem:[%s1669_s5 + $0x38] sm:$0xff]  ;;  %v889_v14 = vld [vmem:[%s1668_s4] ss:$0 sm:$0xff]  ;;  %p1263_p11 = scmp.ne.s32.totalorder %s1618_s8, %s1262_s9  ;;  %p1270_p1 = scmp.lt.s32.totalorder %s1268_s29, %s1262_s9 }
  0x20   : > { %v1169_v11 = vpack.c.bf16 %v590_v10, %v589_v9  ;;  %v890_v54 = vld [vmem:[%s1670_s6] ss:$0 sm:$0xff] }
  0x21   : > { %1112 = vmatpush3.bf16.msra.mxu1 %v1109_v30  ;;  %p1264_p12 = pnand %p1263_p11, %p1407_p5  ;;  %p1271_p2 = por %p1270_p1, %p1269_p0 }
  0x22   : > { %1144 = vmatpush3.bf16.msra.mxu0 %v1141_v31  ;;  %1114 = vmatprep.subr.bf16.mxu1 %v1113_v36 }
  0x23   : > { %1146 = vmatprep.subr.bf16.mxu0 %v1145_v37  ;;  %p1265_p13 = pneg %p1264_p12 }
  0x25   : > { %1116 = vmatpush3.bf16.msra.mxu1 %v1113_v36  ;;  %p1272_p3 = pnand %p1271_p2, %p1265_p13 }
  0x26   : > { %1148 = vmatpush3.bf16.msra.mxu0 %v1145_v37  ;;  %1118 = vmatprep.subr.bf16.mxu1 %v1117_v42 }
  0x27   : > { %1150 = vmatprep.subr.bf16.mxu0 %v1149_v43 }
  0x29   : > { %1120 = vmatpush3.bf16.msra.mxu1 %v1117_v42 }
  0x2a   : > { %1152 = vmatpush3.bf16.msra.mxu0 %v1149_v43  ;;  %1122 = vmatprep.subr.bf16.mxu1 %v1121_v48 }
  0x2b   : > { %1154 = vmatprep.subr.bf16.mxu0 %v1153_v49 }
  0x2d   : > { %1124 = vmatpush3.bf16.msra.mxu1 %v1121_v48 }
  0x2e   : > { %1156 = vmatpush3.bf16.msra.mxu0 %v1153_v49  ;;  %1173 = vmatprep.subr.bf16.mxu1 %v1157_v52 }
  0x2f   : > { %1158 = vmatprep.subr.bf16.mxu0 %v1157_v52 }
  0x30   : > { %1010 = vmatmul.mubr.f32.vlgmr.msra.gmra.mrb[0].mxu1 %v1542_v55 }
  0x31   : > { %1054 = vmatmul.mubr.f32.vlgmr.msra.gmra.mrb[0].mxu0 %v303_v56  ;;  %1012 = vmatprep.mubr.f32.mxu1 %v1546_v57 }
  0x32   : > { %1056 = vmatprep.mubr.f32.mxu0 %v304_v58  ;;  %1160 = vmatpush3.bf16.msra.mxu0 %v1157_v52 }
  0x33   : > { %1162 = vmatprep.subr.bf16.mxu0 %v1161_v59  ;;  %1177 = vmatpush3.bf16.msra.mxu1 %v1157_v52 }
  0x34   : > { %1013 = vmatmul.mubr.f32.gmra.mrb[2].mxu1 %v1552_v60  ;;  %1174 = vmatprep.subr.bf16.mxu1 %v1161_v59 }
  0x35   : > { %1057 = vmatmul.mubr.f32.gmra.mrb[2].mxu0 %v305_v61  ;;  %1015 = vmatprep.mubr.f32.mxu1 %v1556_v62 }
  0x36   : > { %1059 = vmatprep.mubr.f32.mxu0 %v306_v63  ;;  %1164 = vmatpush3.bf16.msra.mxu0 %v1161_v59 }
  0x37   : > { %1178 = vmatpush3.bf16.msra.mxu1 %v1161_v59  ;;  %1166 = vmatprep.subr.bf16.mxu0 %v1165_v8 }
  0x38   : > { %1016 = vmatmul.mubr.f32.gmra.mrb[4].mxu1 %v1562_v0  ;;  %1175 = vmatprep.subr.bf16.mxu1 %v1165_v8 }
  0x39   : > { %1060 = vmatmul.mubr.f32.gmra.mrb[4].mxu0 %v307_v1  ;;  %1018 = vmatprep.mubr.f32.mxu1 %v1566_v2 }
  0x3a   : > { %1062 = vmatprep.mubr.f32.mxu0 %v308_v3  ;;  %1168 = vmatpush3.bf16.msra.mxu0 %v1165_v8 }
  0x3b   : > { %1179 = vmatpush3.bf16.msra.mxu1 %v1165_v8  ;;  %1170 = vmatprep.subr.bf16.mxu0 %v1169_v11 }
  0x3c   : > { %1019 = vmatmul.mubr.f32.gmra.mrb[6].mxu1 %v1572_v4  ;;  %1176 = vmatprep.subr.bf16.mxu1 %v1169_v11 }
  0x3d   : > { %1063 = vmatmul.mubr.f32.gmra.mrb[6].mxu0 %v309_v5 }
  0x3e   : > { %1172 = vmatpush3.bf16.msra.mxu0 %v1169_v11 }
  0x3f   : > { %1180 = vmatpush3.bf16.msra.mxu1 %v1169_v11 }
 0x103   : > { %v1011_v12 = vpop.f32.mrb[0].mxu1 }
 0x104   : > { %v1055_v13 = vpop.f32.mrb[0].mxu0  ;;  %v416_v15 = vpop.f32.mrb[1].mxu1 }
 0x105   : > { %v527_v16 = vadd.f32 %v1055_v13, %v1011_v12  ;;  %v521_v17 = vpop.f32.mrb[1].mxu0 }
 0x106   : > { %v522_v18 = vadd.f32 %v521_v17, %v416_v15 }
 0x107   : > { %v568_v19 = vadd.f32 %v889_v14, %v527_v16  ;;  %v1014_v20 = vpop.f32.mrb[2].mxu1 }
 0x108   : > { %v567_v21 = vadd.f32 %v889_v14, %v522_v18  ;;  %v1058_v22 = vpop.f32.mrb[2].mxu0  ;;  %v426_v23 = vpop.f32.mrb[3].mxu1 }
 0x109   : > { %v537_v24 = vadd.f32 %v1058_v22, %v1014_v20  ;;  %v531_v25 = vpop.f32.mrb[3].mxu0  ;;  %v576_v29 = vmax.f32 %v568_v19, 0.0 }
 0x10a   : > { %v575_v27 = vmax.f32 %v567_v21, 0.0  ;;  %v532_v28 = vadd.f32 %v531_v25, %v426_v23 }
 0x10b   : > { %v570_v30 = vadd.f32 %v889_v14, %v537_v24  ;;  %v1017_v31 = vpop.f32.mrb[4].mxu1 }
 0x10c   : > { %v569_v32 = vadd.f32 %v889_v14, %v532_v28  ;;  %v1061_v33 = vpop.f32.mrb[4].mxu0  ;;  %1081 = vmatprep.mubr.msk.f32.mxu0 %vm598_vm0, %v575_v27  ;;  %v436_v34 = vpop.f32.mrb[5].mxu1 }
 0x10d   : > { %v547_v35 = vadd.f32 %v1061_v33, %v1017_v31  ;;  %v541_v36 = vpop.f32.mrb[5].mxu0  ;;  %1082 = vmatmul.mubr.msk.f32.vlgmr.msra.gmra.mrb[8].mxu0 %vm598_vm0, %v576_v29  ;;  %v578_v39 = vmax.f32 %v570_v30, 0.0 }
 0x10e   : > { %v577_v37 = vmax.f32 %v569_v32, 0.0  ;;  %v542_v38 = vadd.f32 %v541_v36, %v436_v34 }
 0x10f   : > { %v572_v40 = vadd.f32 %v889_v14, %v547_v35  ;;  %v1020_v41 = vpop.f32.mrb[6].mxu1 }
 0x110   : > { %v571_v42 = vadd.f32 %v889_v14, %v542_v38  ;;  %v1064_v43 = vpop.f32.mrb[6].mxu0  ;;  %1084 = vmatprep.mubr.msk.f32.mxu0 %vm598_vm0, %v577_v37  ;;  %v446_v44 = vpop.f32.mrb[7].mxu1 }
 0x111   : > { %v557_v45 = vadd.f32 %v1064_v43, %v1020_v41  ;;  %v551_v46 = vpop.f32.mrb[7].mxu0  ;;  %1085 = vmatmul.mubr.msk.f32.gmra.mrb[10].mxu0 %vm598_vm0, %v578_v39  ;;  %v580_v49 = vmax.f32 %v572_v40, 0.0 }
 0x112   : > { %v579_v47 = vmax.f32 %v571_v42, 0.0  ;;  %v552_v48 = vadd.f32 %v551_v46, %v446_v44 }
 0x113   : > { %v574_v50 = vadd.f32 %v889_v14, %v557_v45 }
 0x114   : > { %v573_v51 = vadd.f32 %v889_v14, %v552_v48  ;;  %1087 = vmatprep.mubr.msk.f32.mxu1 %vm598_vm0, %v579_v47 }
 0x115   : > { %1088 = vmatmul.mubr.msk.f32.vlgmr.msra.gmra.mrb[8].mxu1 %vm598_vm0, %v580_v49  ;;  %v582_v53 = vmax.f32 %v574_v50, 0.0 }
 0x116   : > { %v581_v52 = vmax.f32 %v573_v51, 0.0 }
 0x118   : > { %1090 = vmatprep.mubr.msk.f32.mxu1 %vm598_vm0, %v581_v52 }
 0x119   : > { %1091 = vmatmul.mubr.msk.f32.gmra.mrb[10].mxu1 %vm598_vm0, %v582_v53 }
 0x1e0   : > { %v1083_v56 = vpop.f32.mrb[8].mxu0 }
 0x1e1   : > { %v695_v58 = vadd.f32 %v1083_v56, %v890_v54  ;;  %v689_v59 = vpop.f32.mrb[9].mxu0 }
 0x1e2   : > { %v690_v61 = vadd.f32 %v890_v54, %v689_v59 }
 0x1e3   : > { %v900_v63 = vmul.f32 -1.442695, %v695_v58 }
 0x1e4   : > { %v899_v1 = vmul.f32 -1.442695, %v690_v61  ;;  %v1086_v3 = vpop.f32.mrb[10].mxu0 }
 0x1e5   : > { %1230 = vpow2.f32 %v900_v63  ;;  %v705_v5 = vadd.f32 %v1086_v3, %v890_v54  ;;  %v699_v6 = vpop.f32.mrb[11].mxu0 }
 0x1e6   : > { %1232 = vpow2.f32 %v899_v1  ;;  %v700_v7 = vadd.f32 %v890_v54, %v699_v6 }
 0x1e7   : > { %v902_v8 = vmul.f32 -1.442695, %v705_v5 }
 0x1e8   : > { %v901_v9 = vmul.f32 -1.442695, %v700_v7  ;;  %v1089_v10 = vpop.f32.mrb[8].mxu1 }
 0x1e9   : > { %1234 = vpow2.f32 %v902_v8  ;;  %v715_v11 = vadd.f32 %v1089_v10, %v890_v54  ;;  %v709_v12 = vpop.f32.mrb[9].mxu1 }
 0x1ea   : > { %1236 = vpow2.f32 %v901_v9  ;;  %v710_v13 = vadd.f32 %v890_v54, %v709_v12 }
 0x1eb   : > { %v904_v14 = vmul.f32 -1.442695, %v715_v11 }
 0x1ec   : > { %v903_v15 = vmul.f32 -1.442695, %v710_v13  ;;  %v1092_v16 = vpop.f32.mrb[10].mxu1 }
 0x1ed   : > { %1238 = vpow2.f32 %v904_v14  ;;  %v725_v17 = vadd.f32 %v1092_v16, %v890_v54  ;;  %v719_v18 = vpop.f32.mrb[11].mxu1 }
 0x1ee   : > { %1240 = vpow2.f32 %v903_v15  ;;  %v720_v19 = vadd.f32 %v890_v54, %v719_v18 }
 0x1ef   : > { %v1231_v20 = vpop.eup %1230  ;;  %v906_v21 = vmul.f32 -1.442695, %v725_v17 }
 0x1f0   : > { %v1233_v22 = vpop.eup %1232  ;;  %v753_v23 = vadd.f32 1.0, %v1231_v20  ;;  %v905_v24 = vmul.f32 -1.442695, %v720_v19 }
 0x1f1   : > { %v752_v25 = vadd.f32 1.0, %v1233_v22  ;;  %1242 = vpow2.f32 %v906_v21 }
 0x1f2   : > { %1244 = vrcp.f32 %v753_v23 }
 0x1f3   : > { %v1235_v27 = vpop.eup %1234  ;;  %1246 = vrcp.f32 %v752_v25 }
 0x1f4   : > { %v1237_v28 = vpop.eup %1236  ;;  %v755_v29 = vadd.f32 1.0, %v1235_v27  ;;  %1248 = vpow2.f32 %v905_v24 }
 0x1f5   : > { %v754_v30 = vadd.f32 1.0, %v1237_v28 }
 0x1f6   : > { %1250 = vrcp.f32 %v755_v29 }
 0x1f7   : > { %v1239_v31 = vpop.eup %1238  ;;  %1252 = vrcp.f32 %v754_v30 }
 0x1f8   : > { %v1241_v32 = vpop.eup %1240  ;;  %v757_v33 = vadd.f32 1.0, %v1239_v31 }
 0x1f9   : > { %v756_v34 = vadd.f32 1.0, %v1241_v32 }
 0x1fa   : > { %1254 = vrcp.f32 %v757_v33 }
 0x1fb   : > { %v1243_v35 = vpop.eup %1242  ;;  %1256 = vrcp.f32 %v756_v34 }
 0x1fc   : > { %v1245_v36 = vpop.eup %1244  ;;  %v759_v37 = vadd.f32 1.0, %v1243_v35 }
 0x1fd   : > { %v1247_v38 = vpop.eup %1246  ;;  %v777_v39 = vmul.f32 %v1245_v36, %v1542_v55 }
 0x1fe   : > { %v1249_v40 = vpop.eup %1248  ;;  %v776_v41 = vmul.f32 %v1247_v38, %v1483_v26  ;;  %1258 = vrcp.f32 %v759_v37 }
 0x1ff   : > { %785 = vst [vmem:[%s288_s17 + $0x8] sm:$0xff] %v777_v39  ;;  %v758_v42 = vadd.f32 1.0, %v1249_v40 }
 0x200   : > { %v1251_v43 = vpop.eup %1250  ;;  %784 = vst [vmem:[%s288_s17] sm:$0xff] %v776_v41 }
 0x201   : > { %v1253_v44 = vpop.eup %1252  ;;  %v779_v45 = vmul.f32 %v1251_v43, %v1552_v60  ;;  %1260 = vrcp.f32 %v758_v42 }
 0x202   : > { %v778_v46 = vmul.f32 %v1253_v44, %v1546_v57 }
 0x203   : > { %787 = vst [vmem:[%s288_s17 + $0x18] sm:$0xff] %v779_v45 }
 0x204   : > { %v1255_v47 = vpop.eup %1254  ;;  %786 = vst [vmem:[%s288_s17 + $0x10] sm:$0xff] %v778_v46 }
 0x205   : > { %v1257_v55 = vpop.eup %1256  ;;  %v781_v26 = vmul.f32 %v1255_v47, %v1562_v0 }
 0x206   : > { %v780_v48 = vmul.f32 %v1257_v55, %v1556_v62 }
 0x207   : > { %789 = vst [vmem:[%s288_s17 + $0x28] sm:$0xff] %v781_v26 }
 0x208   : > { %v1259_v49 = vpop.eup %1258  ;;  %788 = vst [vmem:[%s288_s17 + $0x20] sm:$0xff] %v780_v48 }
 0x209   : > { %v783_v60 = vmul.f32 %v1259_v49, %v1572_v4 }
 0x20b   : > { %v1261_v50 = vpop.eup %1260  ;;  %791 = vst [vmem:[%s288_s17 + $0x38] sm:$0xff] %v783_v60 }
 0x20c   : > { %v782_v57 = vmul.f32 %v1261_v50, %v1566_v2 }
 0x20e   : > { %790 = vst [vmem:[%s288_s17 + $0x30] sm:$0xff] %v782_v57 }
 0x20f   : > { %1275 = shalt.err (!%p1272_p3)
}
 0x210   : > { %s1276_s13 = scalar_lea.hbm %s1616_s22, 1024  ;;  %s1280_s16 = scalar_lea.hbm %s1671_s7, 2048 }
 0x211   : > { %p1277_p4 = scmp.ne.s32.totalorder %s1616_s22, %s1276_s13  ;;  %p1281_p9 = scmp.lt.u32.totalorder %s1616_s22, %s1671_s7 }
 0x212   : > { %p1282_p10 = scmp.lt.u32.totalorder %s1280_s16, %s1276_s13  ;;  %p1284_p12 = scmp.lt.u32.totalorder %s1276_s13, %s1616_s22 }
 0x213   : > { %p1278_p7 = pnand %p1277_p4, %p1407_p5 }
 0x214   : > { %p1283_p11 = por %p1282_p10, %p1281_p9 }
 0x215   : > { %p1279_p8 = pneg %p1278_p7 }
 0x216   : > { %p1285_p13 = por %p1284_p12, %p1283_p11 }
 0x218   : > { %p1286_p0 = pnand %p1285_p13, %p1279_p8 }
 0x21a   : > { %1289 = shalt.err (!%p1286_p0)
}
 0x21b   : > { %s1327_s20 = smov 128   ;;  %s1328_s21 = smov 8  }
 0x21c   : > { %1189 = dma.vmem_to_hbm [thread:$0]  (%p1407_p5), %s1618_s8, 1024, %s1616_s22, %s1623_s28, %s1327_s20, %s1327_s20, %s1328_s21  }
 0x21d PF: > { %p1195_p1 = scmp.ge.s32.totalorder %s1324_s27, 2  ;;  %s821_s9 = sand.u32 1, %s1312_s24  }
 0x21e   : > { %s822_s19 = scalar_lea.sflag [#allocation3], %s821_s9 }
 0x21f   : > { %p1192_p2 = pnand %p1195_p1, %p1411_p6 }
 0x221   : > { %1307 = dma.done.wait (!%p1192_p2), %s822_s19, 1024  }
 0x222   : > { %1309 = vsyncadd (!%p1192_p2), %s822_s19, 4294966272  ;;  %p17_p3 = scmp.ge.s32.totalorder %s1394_s30, 4   ;;  %s1674_s24 = smov %s1316_s25 }
 0x223   : > { %s1675_s25 = smov %s1320_s26  ;;  %s1676_s26 = smov %s1405_s10 }
 0x224   : > { %s1677_s27 = smov %s1394_s30  ;;  %19 = sbr.rel (!%p17_p3) target bundleno = 3 (0x3), region = 86 }
 0x22b   :  { %827 = vsyncpa [#allocation3], 1 }
 0x22c   :  { %829 = vsyncpa [#allocation3 + $0x1], 1 }

</bundles_post_ra>
